<compile_context>
chip_gen: v7x
topology: tpu7x:2x2x1
jax: 0.10.0
libtpu: 0.0.40
codegen_flags: <defaults>
</compile_context>

<pallas_src>
import jax
import jax.numpy as jnp
import numpy as np
from jax import lax
from jax.experimental import pallas as pl
from jax.experimental.pallas import tpu as pltpu

EPS = 1e-5


# ----------------------------- Pallas kernels ------------------------------

def _make_conv_bn_relu_kernel(KH, KW, Ho, Wo, Wp, dilation):
    """Grouped conv (KH*KW shifted-window matmuls) + folded BN0 + ReLU.

    Per grid step (conv-group g, batch b):
      x_ref     [Cin_g, Lx]         bf16  flattened padded input of group g
      w_ref     [KH*KW, Cg, Cin_g]  bf16  per-tap weights of group g
      scale_ref [Cg, 1]             f32   folded BN scale
      shift_ref [Cg, 1]             f32   folded BN shift
      mask_ref  [1, Ho*Wp]          f32   1.0 on valid columns, 0.0 on the
                                          (Wp - Wo) wrap columns
      y_ref     [Cg, Ho*Wp]         bf16  output block (spatial on lanes)
    """
    win_len = Ho * Wp

    def kernel(x_ref, w_ref, scale_ref, shift_ref, mask_ref, y_ref):
        acc = None
        for kh in range(KH):
            for kw in range(KW):
                t = kh * KW + kw
                off = (kh * Wp + kw) * dilation          # static flat offset
                win = x_ref[:, pl.ds(off, win_len)]      # [Cin_g, Ho*Wp] bf16
                part = jnp.dot(w_ref[t], win,
                               preferred_element_type=jnp.float32)
                acc = part if acc is None else acc + part
        y = jnp.maximum(acc * scale_ref[...] + shift_ref[...], 0.0)
        y = y * mask_ref[...]                            # zero wrap columns
        y_ref[...] = y.astype(y_ref.dtype)

    return kernel


def _make_attention_kernel(radix, inv_hw):
    """GAP + fc1 + bn1 + relu + fc2 + r-softmax + radix-weighted sum (per batch).

      y_ref  [radix, C, Ho*Wp] bf16   splits produced by kernel 1
      w1_ref [inter, C]        f32    fc1 weight
      b1/s1/t1_ref [inter, 1]  f32    fc1 bias, folded BN1 scale/shift
      w2_ref [radix, C, inter] f32    fc2 weight split per radix chunk
      b2_ref [radix, C, 1]     f32
      o_ref  [C, Ho*Wp]        f32
    """
    def kernel(y_ref, w1_ref, b1_ref, s1_ref, t1_ref, w2_ref, b2_ref, o_ref):
        splits = y_ref[...].astype(jnp.float32)          # [R, C, HWf] f32
        ssum = splits[0]
        for r in range(1, radix):
            ssum = ssum + splits[r]
        gap = jnp.sum(ssum, axis=-1, keepdims=True) * inv_hw    # [C, 1]

        h = jnp.dot(w1_ref[...], gap,
                    preferred_element_type=jnp.float32) + b1_ref[...]
        h = jnp.maximum(h * s1_ref[...] + t1_ref[...], 0.0)     # [inter, 1]

        # fc2 + r-softmax in column-vector form (no lane-offset slicing).
        logits = [jnp.dot(w2_ref[r], h, preferred_element_type=jnp.float32)
                  + b2_ref[r] for r in range(radix)]            # each [C, 1]
        m = logits[0]
        for r in range(1, radix):
            m = jnp.maximum(m, logits[r])
        exps = [jnp.exp(l - m) for l in logits]
        den = exps[0]
        for r in range(1, radix):
            den = den + exps[r]
        inv_den = pl.reciprocal(den, approx=True)               # EUP slot

        out = (exps[0] * inv_den) * splits[0]
        for r in range(1, radix):
            out = out + (exps[r] * inv_den) * splits[r]
        o_ref[...] = out

    return kernel


# ------------------------------- wrapper ------------------------------------

def split_attention_conv2d(x, params, *, radix, groups, stride, padding, dilation):
    # TODO(synk): groups (cardinality) > 1, radix == 1 (sigmoid gate) and
    # stride > 1 are not implemented in the fused shifted-window path.
    assert groups == 1 and radix > 1 and stride == 1

    B, Cin, H, W = x.shape
    w_conv = params['w_conv']                  # [R*C, Cin_g, KH, KW]
    RC, Cin_g, KH, KW = w_conv.shape
    C = RC // radix
    G = groups * radix
    assert Cin_g == Cin // G
    Cg = RC // G                               # == C when groups == 1

    Hp, Wp = H + 2 * padding, W + 2 * padding
    Ho = Hp - dilation * (KH - 1)
    Wo = Wp - dilation * (KW - 1)
    HWf = Ho * Wp                              # flat spatial incl. wrap columns
    tail = dilation * (KW - 1)                 # keeps all tap windows in bounds
    Lx = Hp * Wp + tail
    T = KH * KW

    # ---- host glue: pad once, flatten spatial, cast MXU operands to bf16 ----
    xp = jnp.pad(x, ((0, 0), (0, 0), (padding, padding), (padding, padding)))
    x_flat = xp.reshape(B, Cin, Hp * Wp)
    if tail:
        x_flat = jnp.pad(x_flat, ((0, 0), (0, 0), (0, tail)))
    x_gbcl = x_flat.reshape(B, G, Cin_g, Lx).astype(jnp.bfloat16)

    w_k1 = (w_conv.reshape(G, Cg, Cin_g, T)
            .transpose(0, 3, 1, 2).astype(jnp.bfloat16))        # [G, T, Cg, Cin_g]

    scale0 = params['bn0_gamma'] / jnp.sqrt(params['bn0_var'] + EPS)
    shift0 = params['bn0_beta'] - params['bn0_mean'] * scale0
    scale0_g = scale0.reshape(G, Cg, 1).astype(jnp.float32)
    shift0_g = shift0.reshape(G, Cg, 1).astype(jnp.float32)

    valid = (jnp.arange(HWf) % Wp < Wo).astype(jnp.float32).reshape(1, HWf)

    conv_kernel = _make_conv_bn_relu_kernel(KH, KW, Ho, Wo, Wp, dilation)

    # --- kernel 1: grouped conv + bn0 + relu -> splits [B, radix, C, HWf] bf16
    # 32 MiB explicit VMEM budget works on v5e (16 MiB default scoped),
    # v6e (128 MiB phys) and v7x (64 MiB phys); per-step blocks are << 1 MiB.
    splits = pl.pallas_call(
        conv_kernel,
        out_shape=jax.ShapeDtypeStruct((B, G, Cg, HWf), jnp.bfloat16),
        grid=(G, B),
        in_specs=[
            pl.BlockSpec((None, None, Cin_g, Lx), lambda g, b: (b, g, 0, 0)),
            pl.BlockSpec((None, T, Cg, Cin_g), lambda g, b: (g, 0, 0, 0)),
            pl.BlockSpec((None, Cg, 1), lambda g, b: (g, 0, 0)),
            pl.BlockSpec((None, Cg, 1), lambda g, b: (g, 0, 0)),
            pl.BlockSpec((1, HWf), lambda g, b: (0, 0)),
        ],
        out_specs=pl.BlockSpec((None, None, Cg, HWf), lambda g, b: (b, g, 0, 0)),
        compiler_params=pltpu.CompilerParams(
            dimension_semantics=("parallel", "parallel"),
            vmem_limit_bytes=32 * 1024 * 1024),
    )(x_gbcl, w_k1, scale0_g, shift0_g, valid)

    # ---- attention-stage parameters (tiny, f32, column-vector layout) ----
    inter = params['w_fc1'].shape[0]
    scale1 = params['bn1_gamma'] / jnp.sqrt(params['bn1_var'] + EPS)
    shift1 = params['bn1_beta'] - params['bn1_mean'] * scale1
    w1t = params['w_fc1'].reshape(inter, C).astype(jnp.float32)
    b1c = params['b_fc1'].reshape(inter, 1).astype(jnp.float32)
    s1c = scale1.reshape(inter, 1).astype(jnp.float32)
    t1c = shift1.reshape(inter, 1).astype(jnp.float32)
    w2r = params['w_fc2'].reshape(radix, C, inter).astype(jnp.float32)
    b2c = params['b_fc2'].reshape(radix, C, 1).astype(jnp.float32)

    attn_kernel = _make_attention_kernel(radix, 1.0 / (Ho * Wo))

    # --- kernel 2: gap + fc1 + bn1 + relu + fc2 + rsoftmax + weighted sum ---
    out_flat = pl.pallas_call(
        attn_kernel,
        out_shape=jax.ShapeDtypeStruct((B, C, HWf), jnp.float32),
        grid=(B,),
        in_specs=[
            pl.BlockSpec((None, radix, C, HWf), lambda b: (b, 0, 0, 0)),
            pl.BlockSpec((inter, C), lambda b: (0, 0)),
            pl.BlockSpec((inter, 1), lambda b: (0, 0)),
            pl.BlockSpec((inter, 1), lambda b: (0, 0)),
            pl.BlockSpec((inter, 1), lambda b: (0, 0)),
            pl.BlockSpec((radix, C, inter), lambda b: (0, 0, 0)),
            pl.BlockSpec((radix, C, 1), lambda b: (0, 0, 0)),
        ],
        out_specs=pl.BlockSpec((None, C, HWf), lambda b: (b, 0, 0)),
        compiler_params=pltpu.CompilerParams(
            dimension_semantics=("parallel",),
            vmem_limit_bytes=32 * 1024 * 1024),
    )(splits, w1t, b1c, s1c, t1c, w2r, b2c)

    # drop the (Wp - Wo) wrap columns; pure host reshape + slice, no transpose.
    return out_flat.reshape(B, C, Ho, Wp)[:, :, :, :Wo]


# --------------------------- pure-JAX reference -----------------------------

def reference(x, params, *, radix, groups, stride, padding, dilation):
    w_conv = params['w_conv']
    RC = w_conv.shape[0]
    C = RC // radix
    B = x.shape[0]
    y = lax.conv_general_dilated(
        x, w_conv, window_strides=(stride, stride),
        padding=((padding, padding), (padding, padding)),
        rhs_dilation=(dilation, dilation),
        dimension_numbers=('NCHW', 'OIHW', 'NCHW'),
        feature_group_count=groups * radix)
    scale0 = params['bn0_gamma'] / jnp.sqrt(params['bn0_var'] + EPS)
    shift0 = params['bn0_beta'] - params['bn0_mean'] * scale0
    y = jnp.maximum(y * scale0[None, :, None, None] + shift0[None, :, None, None], 0.0)
    Ho, Wo = y.shape[2], y.shape[3]
    splits = y.reshape(B, radix, C, Ho, Wo)
    gap = splits.sum(axis=1).mean(axis=(2, 3))                      # [B, C]
    inter = params['w_fc1'].shape[0]
    g1 = gap @ params['w_fc1'].reshape(inter, C).T + params['b_fc1']
    scale1 = params['bn1_gamma'] / jnp.sqrt(params['bn1_var'] + EPS)
    shift1 = params['bn1_beta'] - params['bn1_mean'] * scale1
    g1 = jnp.maximum(g1 * scale1 + shift1, 0.0)
    att = g1 @ params['w_fc2'].reshape(RC, inter).T + params['b_fc2']  # [B, R*C]
    att = att.reshape(B, groups, radix, -1).transpose(0, 2, 1, 3)      # rsoftmax
    att = jax.nn.softmax(att, axis=1).reshape(B, RC)
    attens = att.reshape(B, radix, C, 1, 1)
    return (attens * splits).sum(axis=1)


# ---------------------------------- main -------------------------------------

if __name__ == "__main__":
    in_channels, channels = 32, 16
    radix, groups = 2, 1
    KH = KW = 3
    stride, padding, dilation = 1, 1, 1
    reduction_factor = 4
    inter = max(in_channels * radix // reduction_factor, 32)   # 32

    key = jax.random.PRNGKey(0)
    ks = jax.random.split(key, 16)

    def rn(k, shape, s=0.1):
        return (s * jax.random.normal(k, shape)).astype(jnp.float32)

    params = {
        'w_conv':    rn(ks[0], (channels * radix, in_channels // (groups * radix), KH, KW)),
        'bn0_gamma': 1.0 + rn(ks[1], (channels * radix,)),
        'bn0_beta':  rn(ks[2], (channels * radix,)),
        'bn0_mean':  rn(ks[3], (channels * radix,)),
        'bn0_var':   jnp.abs(rn(ks[4], (channels * radix,))) + 1.0,
        'w_fc1':     rn(ks[5], (inter, channels // groups, 1, 1)),
        'b_fc1':     rn(ks[6], (inter,)),
        'bn1_gamma': 1.0 + rn(ks[7], (inter,)),
        'bn1_beta':  rn(ks[8], (inter,)),
        'bn1_mean':  rn(ks[9], (inter,)),
        'bn1_var':   jnp.abs(rn(ks[10], (inter,))) + 1.0,
        'w_fc2':     rn(ks[11], (channels * radix, inter // groups, 1, 1)),
        'b_fc2':     rn(ks[12], (channels * radix,)),
    }
    x = jax.random.normal(ks[13], (2, in_channels, 8, 8), jnp.float32)

    out = split_attention_conv2d(x, params, radix=radix, groups=groups,
                                 stride=stride, padding=padding, dilation=dilation)
    out = jax.block_until_ready(out)

    ref = reference(x, params, radix=radix, groups=groups,
                    stride=stride, padding=padding, dilation=dilation)
    # Tolerance accounts for bf16 MXU operands + bf16 splits storage + approx
    # reciprocal vs the pure-f32 reference (observed error << 1e-2).
    np.testing.assert_allclose(np.asarray(out), np.asarray(ref), rtol=2e-2, atol=2e-2)
    print("KERNEL_OK")
</pallas_src>

<mosaic_0001>
module attributes {stable_mosaic.version = 11 : i64} {
  func.func @kernel(%arg0: i32, %arg1: i32, %arg2: memref<1x1x16x102xbf16, #tpu.memory_space<vmem>>, %arg3: memref<1x9x16x16xbf16, #tpu.memory_space<vmem>>, %arg4: memref<1x16x1xf32, #tpu.memory_space<vmem>>, %arg5: memref<1x16x1xf32, #tpu.memory_space<vmem>>, %arg6: memref<1x80xf32, #tpu.memory_space<vmem>>, %arg7: memref<1x1x16x80xbf16, #tpu.memory_space<vmem>>) attributes {dimension_semantics = [#tpu.dimension_semantics<parallel>, #tpu.dimension_semantics<parallel>], iteration_bounds = array<i64: 2, 2>, scalar_prefetch = 0 : i64, scratch_operands = 0 : i64, tpu.core_type = #tpu.core_type<tc>, window_params = [{transform_indices = @transform_0, window_bounds = array<i64: 1, 1, 16, 102>}, {transform_indices = @transform_1, window_bounds = array<i64: 1, 9, 16, 16>}, {transform_indices = @transform_2, window_bounds = array<i64: 1, 16, 1>}, {transform_indices = @transform_3, window_bounds = array<i64: 1, 16, 1>}, {pipeline_mode = #tpu.pipeline_mode<synchronous>, transform_indices = @transform_4, window_bounds = array<i64: 1, 80>}, {transform_indices = @transform_5, window_bounds = array<i64: 1, 1, 16, 80>}]} {
    %c0 = arith.constant 0 : index
    %c0_0 = arith.constant 0 : index
    %c0_1 = arith.constant 0 : index
    %c0_2 = arith.constant 0 : index
    %0 = vector.load %arg2[%c0, %c0_0, %c0_1, %c0_2] : memref<1x1x16x102xbf16, #tpu.memory_space<vmem>>, vector<1x1x16x80xbf16>
    %1 = vector.shape_cast %0 : vector<1x1x16x80xbf16> to vector<16x80xbf16>
    %c0_3 = arith.constant 0 : index
    %c0_4 = arith.constant 0 : index
    %c0_5 = arith.constant 0 : index
    %c0_6 = arith.constant 0 : index
    %2 = vector.load %arg3[%c0_3, %c0_4, %c0_5, %c0_6] : memref<1x9x16x16xbf16, #tpu.memory_space<vmem>>, vector<1x1x16x16xbf16>
    %3 = vector.shape_cast %2 : vector<1x1x16x16xbf16> to vector<16x16xbf16>
    %cst = arith.constant dense<0.000000e+00> : vector<16x80xf32>
    %4 = tpu.matmul %3, %1, %cst {dimension_numbers = #tpu.dot_dimension_numbers<[1], [0], [0], [1], [0, 0, 1, 1], [], []>} : vector<16x16xbf16>, vector<16x80xbf16>, vector<16x80xf32> -> vector<16x80xf32>
    %c0_7 = arith.constant 0 : index
    %c0_8 = arith.constant 0 : index
    %c0_9 = arith.constant 0 : index
    %c1 = arith.constant 1 : index
    %5 = vector.load %arg2[%c0_7, %c0_8, %c0_9, %c1] : memref<1x1x16x102xbf16, #tpu.memory_space<vmem>>, vector<1x1x16x80xbf16>
    %6 = vector.shape_cast %5 : vector<1x1x16x80xbf16> to vector<16x80xbf16>
    %c0_10 = arith.constant 0 : index
    %c1_11 = arith.constant 1 : index
    %c0_12 = arith.constant 0 : index
    %c0_13 = arith.constant 0 : index
    %7 = vector.load %arg3[%c0_10, %c1_11, %c0_12, %c0_13] : memref<1x9x16x16xbf16, #tpu.memory_space<vmem>>, vector<1x1x16x16xbf16>
    %8 = vector.shape_cast %7 : vector<1x1x16x16xbf16> to vector<16x16xbf16>
    %cst_14 = arith.constant dense<0.000000e+00> : vector<16x80xf32>
    %9 = tpu.matmul %8, %6, %cst_14 {dimension_numbers = #tpu.dot_dimension_numbers<[1], [0], [0], [1], [0, 0, 1, 1], [], []>} : vector<16x16xbf16>, vector<16x80xbf16>, vector<16x80xf32> -> vector<16x80xf32>
    %10 = arith.addf %4, %9 : vector<16x80xf32>
    %c0_15 = arith.constant 0 : index
    %c0_16 = arith.constant 0 : index
    %c0_17 = arith.constant 0 : index
    %c2 = arith.constant 2 : index
    %11 = vector.load %arg2[%c0_15, %c0_16, %c0_17, %c2] : memref<1x1x16x102xbf16, #tpu.memory_space<vmem>>, vector<1x1x16x80xbf16>
    %12 = vector.shape_cast %11 : vector<1x1x16x80xbf16> to vector<16x80xbf16>
    %c0_18 = arith.constant 0 : index
    %c2_19 = arith.constant 2 : index
    %c0_20 = arith.constant 0 : index
    %c0_21 = arith.constant 0 : index
    %13 = vector.load %arg3[%c0_18, %c2_19, %c0_20, %c0_21] : memref<1x9x16x16xbf16, #tpu.memory_space<vmem>>, vector<1x1x16x16xbf16>
    %14 = vector.shape_cast %13 : vector<1x1x16x16xbf16> to vector<16x16xbf16>
    %cst_22 = arith.constant dense<0.000000e+00> : vector<16x80xf32>
    %15 = tpu.matmul %14, %12, %cst_22 {dimension_numbers = #tpu.dot_dimension_numbers<[1], [0], [0], [1], [0, 0, 1, 1], [], []>} : vector<16x16xbf16>, vector<16x80xbf16>, vector<16x80xf32> -> vector<16x80xf32>
    %16 = arith.addf %10, %15 : vector<16x80xf32>
    %c0_23 = arith.constant 0 : index
    %c0_24 = arith.constant 0 : index
    %c0_25 = arith.constant 0 : index
    %c10 = arith.constant 10 : index
    %17 = vector.load %arg2[%c0_23, %c0_24, %c0_25, %c10] : memref<1x1x16x102xbf16, #tpu.memory_space<vmem>>, vector<1x1x16x80xbf16>
    %18 = vector.shape_cast %17 : vector<1x1x16x80xbf16> to vector<16x80xbf16>
    %c0_26 = arith.constant 0 : index
    %c3 = arith.constant 3 : index
    %c0_27 = arith.constant 0 : index
    %c0_28 = arith.constant 0 : index
    %19 = vector.load %arg3[%c0_26, %c3, %c0_27, %c0_28] : memref<1x9x16x16xbf16, #tpu.memory_space<vmem>>, vector<1x1x16x16xbf16>
    %20 = vector.shape_cast %19 : vector<1x1x16x16xbf16> to vector<16x16xbf16>
    %cst_29 = arith.constant dense<0.000000e+00> : vector<16x80xf32>
    %21 = tpu.matmul %20, %18, %cst_29 {dimension_numbers = #tpu.dot_dimension_numbers<[1], [0], [0], [1], [0, 0, 1, 1], [], []>} : vector<16x16xbf16>, vector<16x80xbf16>, vector<16x80xf32> -> vector<16x80xf32>
    %22 = arith.addf %16, %21 : vector<16x80xf32>
    %c0_30 = arith.constant 0 : index
    %c0_31 = arith.constant 0 : index
    %c0_32 = arith.constant 0 : index
    %c11 = arith.constant 11 : index
    %23 = vector.load %arg2[%c0_30, %c0_31, %c0_32, %c11] : memref<1x1x16x102xbf16, #tpu.memory_space<vmem>>, vector<1x1x16x80xbf16>
    %24 = vector.shape_cast %23 : vector<1x1x16x80xbf16> to vector<16x80xbf16>
    %c0_33 = arith.constant 0 : index
    %c4 = arith.constant 4 : index
    %c0_34 = arith.constant 0 : index
    %c0_35 = arith.constant 0 : index
    %25 = vector.load %arg3[%c0_33, %c4, %c0_34, %c0_35] : memref<1x9x16x16xbf16, #tpu.memory_space<vmem>>, vector<1x1x16x16xbf16>
    %26 = vector.shape_cast %25 : vector<1x1x16x16xbf16> to vector<16x16xbf16>
    %cst_36 = arith.constant dense<0.000000e+00> : vector<16x80xf32>
    %27 = tpu.matmul %26, %24, %cst_36 {dimension_numbers = #tpu.dot_dimension_numbers<[1], [0], [0], [1], [0, 0, 1, 1], [], []>} : vector<16x16xbf16>, vector<16x80xbf16>, vector<16x80xf32> -> vector<16x80xf32>
    %28 = arith.addf %22, %27 : vector<16x80xf32>
    %c0_37 = arith.constant 0 : index
    %c0_38 = arith.constant 0 : index
    %c0_39 = arith.constant 0 : index
    %c12 = arith.constant 12 : index
    %29 = vector.load %arg2[%c0_37, %c0_38, %c0_39, %c12] : memref<1x1x16x102xbf16, #tpu.memory_space<vmem>>, vector<1x1x16x80xbf16>
    %30 = vector.shape_cast %29 : vector<1x1x16x80xbf16> to vector<16x80xbf16>
    %c0_40 = arith.constant 0 : index
    %c5 = arith.constant 5 : index
    %c0_41 = arith.constant 0 : index
    %c0_42 = arith.constant 0 : index
    %31 = vector.load %arg3[%c0_40, %c5, %c0_41, %c0_42] : memref<1x9x16x16xbf16, #tpu.memory_space<vmem>>, vector<1x1x16x16xbf16>
    %32 = vector.shape_cast %31 : vector<1x1x16x16xbf16> to vector<16x16xbf16>
    %cst_43 = arith.constant dense<0.000000e+00> : vector<16x80xf32>
    %33 = tpu.matmul %32, %30, %cst_43 {dimension_numbers = #tpu.dot_dimension_numbers<[1], [0], [0], [1], [0, 0, 1, 1], [], []>} : vector<16x16xbf16>, vector<16x80xbf16>, vector<16x80xf32> -> vector<16x80xf32>
    %34 = arith.addf %28, %33 : vector<16x80xf32>
    %c0_44 = arith.constant 0 : index
    %c0_45 = arith.constant 0 : index
    %c0_46 = arith.constant 0 : index
    %c20 = arith.constant 20 : index
    %35 = vector.load %arg2[%c0_44, %c0_45, %c0_46, %c20] : memref<1x1x16x102xbf16, #tpu.memory_space<vmem>>, vector<1x1x16x80xbf16>
    %36 = vector.shape_cast %35 : vector<1x1x16x80xbf16> to vector<16x80xbf16>
    %c0_47 = arith.constant 0 : index
    %c6 = arith.constant 6 : index
    %c0_48 = arith.constant 0 : index
    %c0_49 = arith.constant 0 : index
    %37 = vector.load %arg3[%c0_47, %c6, %c0_48, %c0_49] : memref<1x9x16x16xbf16, #tpu.memory_space<vmem>>, vector<1x1x16x16xbf16>
    %38 = vector.shape_cast %37 : vector<1x1x16x16xbf16> to vector<16x16xbf16>
    %cst_50 = arith.constant dense<0.000000e+00> : vector<16x80xf32>
    %39 = tpu.matmul %38, %36, %cst_50 {dimension_numbers = #tpu.dot_dimension_numbers<[1], [0], [0], [1], [0, 0, 1, 1], [], []>} : vector<16x16xbf16>, vector<16x80xbf16>, vector<16x80xf32> -> vector<16x80xf32>
    %40 = arith.addf %34, %39 : vector<16x80xf32>
    %c0_51 = arith.constant 0 : index
    %c0_52 = arith.constant 0 : index
    %c0_53 = arith.constant 0 : index
    %c21 = arith.constant 21 : index
    %41 = vector.load %arg2[%c0_51, %c0_52, %c0_53, %c21] : memref<1x1x16x102xbf16, #tpu.memory_space<vmem>>, vector<1x1x16x80xbf16>
    %42 = vector.shape_cast %41 : vector<1x1x16x80xbf16> to vector<16x80xbf16>
    %c0_54 = arith.constant 0 : index
    %c7 = arith.constant 7 : index
    %c0_55 = arith.constant 0 : index
    %c0_56 = arith.constant 0 : index
    %43 = vector.load %arg3[%c0_54, %c7, %c0_55, %c0_56] : memref<1x9x16x16xbf16, #tpu.memory_space<vmem>>, vector<1x1x16x16xbf16>
    %44 = vector.shape_cast %43 : vector<1x1x16x16xbf16> to vector<16x16xbf16>
    %cst_57 = arith.constant dense<0.000000e+00> : vector<16x80xf32>
    %45 = tpu.matmul %44, %42, %cst_57 {dimension_numbers = #tpu.dot_dimension_numbers<[1], [0], [0], [1], [0, 0, 1, 1], [], []>} : vector<16x16xbf16>, vector<16x80xbf16>, vector<16x80xf32> -> vector<16x80xf32>
    %46 = arith.addf %40, %45 : vector<16x80xf32>
    %c0_58 = arith.constant 0 : index
    %c0_59 = arith.constant 0 : index
    %c0_60 = arith.constant 0 : index
    %c22 = arith.constant 22 : index
    %47 = vector.load %arg2[%c0_58, %c0_59, %c0_60, %c22] : memref<1x1x16x102xbf16, #tpu.memory_space<vmem>>, vector<1x1x16x80xbf16>
    %48 = vector.shape_cast %47 : vector<1x1x16x80xbf16> to vector<16x80xbf16>
    %c0_61 = arith.constant 0 : index
    %c8 = arith.constant 8 : index
    %c0_62 = arith.constant 0 : index
    %c0_63 = arith.constant 0 : index
    %49 = vector.load %arg3[%c0_61, %c8, %c0_62, %c0_63] : memref<1x9x16x16xbf16, #tpu.memory_space<vmem>>, vector<1x1x16x16xbf16>
    %50 = vector.shape_cast %49 : vector<1x1x16x16xbf16> to vector<16x16xbf16>
    %cst_64 = arith.constant dense<0.000000e+00> : vector<16x80xf32>
    %51 = tpu.matmul %50, %48, %cst_64 {dimension_numbers = #tpu.dot_dimension_numbers<[1], [0], [0], [1], [0, 0, 1, 1], [], []>} : vector<16x16xbf16>, vector<16x80xbf16>, vector<16x80xf32> -> vector<16x80xf32>
    %52 = arith.addf %46, %51 : vector<16x80xf32>
    %c0_65 = arith.constant 0 : index
    %c0_66 = arith.constant 0 : index
    %c0_67 = arith.constant 0 : index
    %53 = vector.load %arg4[%c0_65, %c0_66, %c0_67] : memref<1x16x1xf32, #tpu.memory_space<vmem>>, vector<1x16x1xf32>
    %54 = vector.shape_cast %53 : vector<1x16x1xf32> to vector<16x1xf32>
    %55 = vector.broadcast %54 : vector<16x1xf32> to vector<16x80xf32>
    %56 = arith.mulf %52, %55 : vector<16x80xf32>
    %c0_68 = arith.constant 0 : index
    %c0_69 = arith.constant 0 : index
    %c0_70 = arith.constant 0 : index
    %57 = vector.load %arg5[%c0_68, %c0_69, %c0_70] : memref<1x16x1xf32, #tpu.memory_space<vmem>>, vector<1x16x1xf32>
    %58 = vector.shape_cast %57 : vector<1x16x1xf32> to vector<16x1xf32>
    %59 = vector.broadcast %58 : vector<16x1xf32> to vector<16x80xf32>
    %60 = arith.addf %56, %59 : vector<16x80xf32>
    %cst_71 = arith.constant 0.000000e+00 : f32
    %61 = vector.broadcast %cst_71 : f32 to vector<16x80xf32>
    %62 = arith.maximumf %60, %61 : vector<16x80xf32>
    %c0_72 = arith.constant 0 : index
    %c0_73 = arith.constant 0 : index
    %63 = vector.load %arg6[%c0_72, %c0_73] : memref<1x80xf32, #tpu.memory_space<vmem>>, vector<1x80xf32>
    %64 = vector.broadcast %63 : vector<1x80xf32> to vector<16x80xf32>
    %65 = arith.mulf %62, %64 : vector<16x80xf32>
    %66 = arith.truncf %65 : vector<16x80xf32> to vector<16x80xbf16>
    %c0_74 = arith.constant 0 : index
    %c0_75 = arith.constant 0 : index
    %c0_76 = arith.constant 0 : index
    %c0_77 = arith.constant 0 : index
    %67 = vector.load %arg7[%c0_74, %c0_75, %c0_76, %c0_77] : memref<1x1x16x80xbf16, #tpu.memory_space<vmem>>, vector<1x1x16x80xbf16>
    %68 = vector.shape_cast %67 : vector<1x1x16x80xbf16> to vector<16x80xbf16>
    %69 = vector.shape_cast %66 : vector<16x80xbf16> to vector<1x1x16x80xbf16>
    tpu.vector_store %arg7[%c0_74, %c0_75, %c0_76, %c0_77], %69 {strides = array<i32>} : memref<1x1x16x80xbf16, #tpu.memory_space<vmem>>, vector<1x1x16x80xbf16>,
    return
  }
  func.func @transform_0(%arg0: i32, %arg1: i32) -> (i32, i32, i32, i32) {
    %c0_i32 = arith.constant 0 : i32
    %c0_i32_0 = arith.constant 0 : i32
    %c0_i32_1 = arith.constant 0 : i32
    return %arg1, %arg0, %c0_i32, %c0_i32_0 : i32, i32, i32, i32
  }
  func.func @transform_1(%arg0: i32, %arg1: i32) -> (i32, i32, i32, i32) {
    %c0_i32 = arith.constant 0 : i32
    %c0_i32_0 = arith.constant 0 : i32
    %c0_i32_1 = arith.constant 0 : i32
    %c0_i32_2 = arith.constant 0 : i32
    return %arg0, %c0_i32, %c0_i32_0, %c0_i32_1 : i32, i32, i32, i32
  }
  func.func @transform_2(%arg0: i32, %arg1: i32) -> (i32, i32, i32) {
    %c0_i32 = arith.constant 0 : i32
    %c0_i32_0 = arith.constant 0 : i32
    %c0_i32_1 = arith.constant 0 : i32
    return %arg0, %c0_i32, %c0_i32_0 : i32, i32, i32
  }
  func.func @transform_3(%arg0: i32, %arg1: i32) -> (i32, i32, i32) {
    %c0_i32 = arith.constant 0 : i32
    %c0_i32_0 = arith.constant 0 : i32
    %c0_i32_1 = arith.constant 0 : i32
    return %arg0, %c0_i32, %c0_i32_0 : i32, i32, i32
  }
  func.func @transform_4(%arg0: i32, %arg1: i32) -> (i32, i32) {
    %c0_i32 = arith.constant 0 : i32
    %c0_i32_0 = arith.constant 0 : i32
    %c0_i32_1 = arith.constant 0 : i32
    return %c0_i32, %c0_i32_0 : i32, i32
  }
  func.func @transform_5(%arg0: i32, %arg1: i32) -> (i32, i32, i32, i32) {
    %c0_i32 = arith.constant 0 : i32
    %c0_i32_0 = arith.constant 0 : i32
    %c0_i32_1 = arith.constant 0 : i32
    return %arg1, %arg0, %c0_i32, %c0_i32_0 : i32, i32, i32, i32
  }
}

</mosaic_0001>

<bundles_post_ra>
// kernel: tpu_custom_call.1
= control target key start
LH: loop header
LB: loop body
LE: loop exit
PB: predicated region body
PF: predicated region fallthrough
CT: control target
= control target key end

     0   :  { %s1834_s0 = inlined_call_operand.vmem [shape: bf16[2,2,16,102], index: 0, kind: input, shape index: {}]   ;;  %s1835_s1 = inlined_call_operand.hbm [shape: bf16[2,9,16,16], index: 1, kind: input, shape index: {}]   ;;  %s1836_s2 = inlined_call_operand.vmem [shape: f32[2,16,1], index: 2, kind: input, shape index: {}]   ;;  %s1837_s3 = inlined_call_operand.vmem [shape: f32[2,16,1], index: 3, kind: input, shape index: {}]   ;;  %s1838_s4 = inlined_call_operand.vmem [shape: f32[1,80], index: 4, kind: input, shape index: {}]   ;;  %s1839_s5 = inlined_call_operand.hbm [shape: bf16[2,2,16,80], index: 5, kind: output, shape index: {}]  }
   0x1   :  { %1845 = sst [smem:[#allocation13_spill]] %s1835_s1 }
   0x2   :  { %10 = vsyncpa [#allocation3], 0 }
   0x3   :  { %12 = vsyncpa [#allocation3 + $0x1], 0 }
   0x4   :  { %13 = vsyncpa [#allocation4], 0 }
   0x5   :  { %15 = vsyncpa [#allocation4 + $0x1], 0  ;;  %s1541_s18 = smov 0   ;;  %s1543_s19 = smov 0  }
   0x6   :  { %s1545_s20 = smov 0   ;;  %s1547_s21 = smov 0  }
   0x7   :  { %s1549_s22 = smov 0   ;;  %s1551_s23 = smov 0  }
   0x8   :  { %s1553_s24 = smov 0   ;;  %s1555_s25 = smov 0  }
   0x9   :  { %s1557_s26 = smov 0   ;;  %s1559_s27 = smov 0  }
   0xa   :  { %s1561_s28 = smov 0  }
   0xb LB: > { %1846 = sst [smem:[#allocation8_spill]] %s1484_s26  ;;  %s1044_s29 = sadd.s32 4294967295, %s1492_s28   ;;  %s1492_s28 = sphi %s1561_s28, %s21_s28   ;;  %s1488_s27 = sphi %s1559_s27, %s1864_s27   ;;  %s1484_s26 = sphi %s1557_s26, %s1863_s26   ;;  %s1480_s25 = sphi %s1555_s25, %s1862_s25   ;;  %s1476_s24 = sphi %s1553_s24, %s1861_s24   ;;  %s1472_s23 = sphi %s1551_s23, %s1870_s23   ;;  %s1468_s22 = sphi %s1549_s22, %s1869_s22   ;;  %s1464_s21 = sphi %s1547_s21, %s1868_s21   ;;  %s1460_s20 = sphi %s1545_s20, %s1867_s20   ;;  %s1456_s19 = sphi %s1543_s19, %s1866_s19   ;;  %s1452_s18 = sphi %s1541_s18, %s1865_s18  }
   0xc   : > { %1847 = sst [smem:[#allocation9_spill]] %s1488_s27  ;;  %s1045_s30 = sadd.s32 4294967294, %s1492_s28  }
   0xd   : > { %s30_s6 = sadd.s32 1, %s1484_s26  ;;  %s33_s7 = sadd.s32 1, %s1488_s27 }
   0xe   : > { %p31_p0 = scmp.ge.s32.totalorder %s30_s6, 2  ;;  %s68_s8 = sadd.s32 1, %s1472_s23 }
   0xf   : > { %p75_p1 = scmp.ne.s32.totalorder %s1472_s23, %s1468_s22  ;;  %p76_p2 = scmp.eq.s32.totalorder %s1492_s28, 0 }
  0x10   : > { %s1872_s6 = smov (%p31_p0, %s30_s6), 0  ;;  %s1874_s7 = smov (!%p31_p0, %s33_s7), %s1488_s27 }
  0x11   : > { %1848 = sst [smem:[#allocation10_spill]] %s1872_s6  ;;  %p1605_p3 = por %p76_p2, %p75_p1 }
  0x12   : > { %p81_p4 = scmp.ne.s32.totalorder %s1468_s22, %s1464_s21  ;;  %p35_p5 = scmp.ge.s32.totalorder %s1874_s7, 2 }
  0x13   : > { %p82_p6 = scmp.eq.s32.totalorder %s1044_s29, 0  ;;  %s164_s10 = ssub.s32 %s1484_s26, %s1872_s6 }
  0x14   : > { %s169_s11 = sadd.s32 1, %s1460_s20  ;;  %s1876_s7 = smov (%p35_p5, %s1874_s7), 0 }
  0x15   : > { %1850 = sst [smem:[#allocation11_spill]] %s1876_s7  ;;  %p1615_p7 = por %p82_p6, %p81_p4 }
  0x16   : > { %p179_p8 = scmp.ne.s32.totalorder %s1460_s20, %s1456_s19  ;;  %s65_s13 = ssub.s32 %s1488_s27, %s1876_s7 }
  0x17   : > { %p180_p9 = scmp.eq.s32.totalorder %s1044_s29, 3  ;;  %p66_p10 = scmp.eq.s32.totalorder %s65_s13, 0 }
  0x18   : > { %s166_s14 = sor.u32 %s164_s10, %s65_s13  ;;  %p185_p13 = scmp.ne.s32.totalorder %s1456_s19, %s1452_s18 }
  0x19   : > { %p167_p11 = scmp.eq.s32.totalorder %s166_s14, 0  ;;  %p1623_p12 = por %p180_p9, %p179_p8 }
  0x1a   : > { %s1628_s16 = scalar_select %p66_p10, %s1472_s23, %s68_s8  }
  0x1b   : > { %s1852_s15 = scalar_select %p1623_p12, 1, 0 }
  0x1c   : > { %1853 = sst [smem:[#allocation12_spill]] %s1628_s16  ;;  %p186_p0 = scmp.eq.s32.totalorder %s1045_s30, 3 }
  0x1d   : > { %s1631_s17 = scalar_select %p167_p11, %s1460_s20, %s169_s11  }
  0x1e   : > { %p1223_p1 = scmp.lt.s32.totalorder %s1492_s28, 4  ;;  %p1636_p2 = por %p186_p0, %p185_p13 }
  0x1f   : > { %s221_s29 = sand.u32 1, %s1472_s23   ;;  %s1209_s10 = smul.u32 1152, %s1488_s27 }
  0x20   : > { %s1854_s21 = scalar_select %p1636_p2, 1, 0 }
  0x21   : > { %s1208_s7 = smul.u32 72, %s221_s29  ;;  %p1644_p4 = pnand %p1223_p1, %p1605_p3 }
  0x22   : > { %s1856_s1 = sld [smem:[#allocation13_spill]]  ;;  %s1656_s9 = scalar_lea.sflag [#allocation3], %s221_s29 }
  0x23   : > { %s225_s30 = scalar_lea.vmem [#allocation2], %s1208_s7  ;;  %p1342_p6 = pneg %p1644_p4 }
  0x24   : > { %s232_s6 = sshll.u32 %s225_s30, 4  ;;  %s1653_s6 = int_to_ptr.vmem [resolvable:$true] %s232_s6 }
  0x28   : > { %s1651_s11 = scalar_lea.hbm %s1856_s1, %s1209_s10  ;;  %s1345_s8 = scalar_lea.hbm %s1856_s1, 2304 }
  0x29   : > { %s1340_s27 = scalar_lea.hbm %s1651_s11, 1152  ;;  %p1346_p10 = scmp.lt.u32.totalorder %s1651_s11, %s1856_s1 }
  0x2a   : > { %p1341_p3 = scmp.ne.s32.totalorder %s1651_s11, %s1340_s27  ;;  %p1347_p11 = scmp.lt.u32.totalorder %s1345_s8, %s1340_s27 }
  0x2b   : > { %p1349_p0 = scmp.lt.u32.totalorder %s1340_s27, %s1651_s11 }
  0x2c   : > { %p1343_p8 = pnand %p1342_p6, %p1341_p3  ;;  %p1348_p13 = por %p1347_p11, %p1346_p10 }
  0x2e   : > { %p1344_p9 = pneg %p1343_p8  ;;  %p1350_p1 = por %p1349_p0, %p1348_p13 }
  0x30   : > { %p1351_p5 = pnand %p1350_p1, %p1344_p9 }
  0x32   : > { %1354 = shalt.err (!%p1351_p5)
}
  0x33   : > { %s1355_s29 = scalar_lea.vmem %s1653_s6, 1152  ;;  %s1494_s30 = smov [#allocation2]  }
  0x34   : > { %p1356_p3 = scmp.ne.s32.totalorder %s1653_s6, %s1355_s29  ;;  %s1360_s10 = sshll.u32 %s1494_s30, 4  ;;  %s1361_s10 = int_to_ptr.vmem [resolvable:$false] %s1360_s10 }
  0x35   : > { %s1362_s26 = scalar_lea.vmem %s1361_s10, 2304  ;;  %p1363_p12 = scmp.lt.s32.totalorder %s1653_s6, %s1361_s10 }
  0x36   : > { %p1358_p8 = pnand %p1356_p3, %p1342_p6  ;;  %p1364_p10 = scmp.lt.s32.totalorder %s1362_s26, %s1355_s29 }
  0x38   : > { %p1359_p2 = pneg %p1358_p8  ;;  %p1365_p11 = por %p1364_p10, %p1363_p12 }
  0x3a   : > { %p1366_p13 = pnand %p1365_p11, %p1359_p2 }
  0x3c   : > { %1369 = shalt.err (!%p1366_p13)
}
  0x3d   : > { %s1495_s27 = smov 64   ;;  %s1496_s14 = smov 4  }
  0x3e   : > { %1218 = dma.hbm_to_vmem [thread:$0]  (!%p1644_p4), %s1651_s11, 1152, %s1653_s6, %s1656_s9, %s1495_s27, %s1495_s27, %s1496_s14  }
  0x3f   : > { %p256_p5 = scmp.lt.s32.totalorder %s1492_s28, 5  ;;  %p1857_p6 = scmp.ge.s32.totalorder %s1492_s28, 1 }
  0x41   : > { %p257_p9 = pnand %p1857_p6, %p256_p5 }
  0x42   : > { %s262_s8 = sand.u32 (!%p257_p9), 1, %s1468_s22  }
  0x43   : > { %260 = sbr.rel (%p257_p9) target bundleno = 492 (0x1ec), region = 40  ;;  %s263_s29 = scalar_lea.sflag (!%p257_p9), [#allocation3], %s262_s8 }
  0x44   : > { %s1210_s7 = smul.u32 (!%p257_p9), 72, %s262_s8 }
  0x46   : > { %s1688_s30 = scalar_lea.vmem (!%p257_p9), [#allocation2], %s1210_s7 }
  0x4a   : > { %1443 = dma.done.wait (%p1615_p7), %s263_s29, 1152  }
  0x4b   : > { %1445 = vsyncadd (%p1615_p7), %s263_s29, 4294966144  ;;  %p312_p12 = scmp.lt.s32.totalorder %s1476_s24, 1  ;;  %p314_p2 = scmp.lt.s32.totalorder %s1480_s25, 1  ;;  %v1497_v0 = vmov 0.0   ;;  %vm1498_vm0 = vmmov 0   ;;  %v1507_v2 = vmov 0  }
  0x4c   : > { %1148 = vmatprep.subr.bf16.mxu0 %v1497_v0  ;;  %1150 = vmatprep.mubr.msk.bf16.mxu0 %vm1498_vm0, %v1497_v0  ;;  %s1499_s8 = smov 117   ;;  %s1500_s7 = smov 116   ;;  %v1331_v8 = vld [vmem:[%s1688_s30 + $0x20] sm:$0xff]   ;;  %vm352_vm1 = vcmask 130048   ;;  %v1332_v11 = vld [vmem:[%s1688_s30 + $0x8] sm:$0xff]   ;;  %v1335_v16 = vld [vmem:[%s1688_s30 + $0x30] sm:$0xff]  }
  0x4d   : > { %s313_s6 = scalar_select %p312_p12, %s1476_s24, 1  ;;  %1124 = vmatprep.subr.bf16.mxu1 %v1497_v0  ;;  %1126 = vmatprep.mubr.msk.bf16.mxu1 %vm1498_vm0, %v1497_v0  ;;  %v1333_v12 = vld [vmem:[%s1688_s30 + $0x28] sm:$0xff]   ;;  %v1334_v14 = vld [vmem:[%s1688_s30] sm:$0xff]   ;;  %v1336_v18 = vld [vmem:[%s1688_s30 + $0x10] sm:$0xff]   ;;  %vm893_vm2 = vcmask 650240  }
  0x4e   : > { %s1704_s12 = scalar_select %p314_p2, %s1480_s25, 1  ;;  %1329 = vset.pattern.permute.xlu1 %v1507_v2  ;;  %1328 = vset.pattern.permute.xlu0 %v1507_v2  ;;  %v1337_v20 = vld [vmem:[%s1688_s30 + $0x38] sm:$0xff]   ;;  %v1339_v23 = vld [vmem:[%s1688_s30 + $0x40] sm:$0xff]  }
  0x4f   : > { %s1052_s13 = sshll.u32 %s313_s6, 2  ;;  %s1501_s29 = smov 127   ;;  %v1338_v22 = vld [vmem:[%s1688_s30 + $0x18] sm:$0xff]  }
  0x50   : > { %s1051_s11 = sshll.u32 %s1704_s12, 1  ;;  %s1502_s1 = smov 108   ;;  %v1093_v40 = vld [vmem:[%s1838_s4] ss:$0 sm:$0xff] }
  0x51   : > { %s318_s9 = sadd.s32 %s1052_s13, %s1051_s11  ;;  %s1503_s16 = smov 107  }
  0x52   : > { %s1053_s10 = sshll.u32 %s318_s9, 2  ;;  %s1504_s6 = smov 126  }
  0x53   : > { %s320_s14 = scalar_lea.vmem %s1834_s0, %s1053_s10  ;;  %s1505_s13 = smov 106  }
  0x54   : > { %v1330_v1 = vld [vmem:[%s320_s14] sm:$0xff]   ;;  %s1506_s11 = smov 118   ;;  %s1102_s9 = sshll.u32 %s1704_s12, 4 }
  0x55   : > { %569 = vrot.lane.b32.xlu0 %v1330_v1, %s1499_s8  ;;  %626 = vrot.lane.b32.xlu1 %v1330_v1, %s1500_s7  ;;  %s325_s27 = scalar_lea.vmem %s1836_s2, %s1102_s9  ;;  %s1097_s30 = sshll.u32 %s1480_s25, 1 }
  0x56   : > { %v847_v3 = vld [vmem:[%s325_s27 + $0x8] sm:$0xff]  ;;  %v846_v4 = vld [vmem:[%s325_s27] sm:$0xff]  ;;  %s1098_s7 = sshll.u32 %s1476_s24, 2  ;;  %p1858_p4 = scmp.ne.s32.totalorder %s1852_s15, 0 }
  0x57   : > { %s1508_s8 = smov [#allocation5]  }
  0x59   : > { %349 = vrot.lane.b32.xlu0 %v1330_v1, %s1501_s29  ;;  %683 = vrot.lane.b32.xlu1 %v1330_v1, %s1502_s1  ;;  %s330_s1 = scalar_lea.vmem %s1837_s3, %s1102_s9 }
  0x5a   : > { %v860_v5 = vld [vmem:[%s330_s1] sm:$0xff]  ;;  %v861_v6 = vld [vmem:[%s330_s1 + $0x8] sm:$0xff]  ;;  %s1374_s1 = sshll.u32 %s1508_s8, 4  ;;  %s1375_s1 = int_to_ptr.vmem [resolvable:$false] %s1374_s1 }
  0x5d   : > { %740 = vrot.lane.b32.xlu1 %v1330_v1, %s1503_s16  ;;  %455 = vrot.lane.b32.xlu0 %v1330_v1, %s1504_s6  ;;  %s309_s16 = sand.u32 1, %s1456_s19  }
  0x5e   : > { %s1050_s12 = sshll.u32 %s309_s16, 3  ;;  %s1773_s27 = scalar_lea.sflag [#allocation4], %s309_s16 }
  0x5f   : > { %s311_s9 = scalar_lea.vmem [#allocation5], %s1050_s12  ;;  %s1376_s12 = scalar_lea.vmem %s1375_s1, 256 }
  0x60   : > { %s912_s10 = sshll.u32 %s311_s9, 4  ;;  %s1769_s10 = int_to_ptr.vmem [resolvable:$true] %s912_s10 }
  0x61   : > { %797 = vrot.lane.b32.xlu1 %v1330_v1, %s1505_s13  ;;  %512 = vrot.lane.b32.xlu0 %v1330_v1, %s1506_s11  ;;  %s909_s13 = sadd.s32 %s1098_s7, %s1097_s30  ;;  %s1370_s14 = scalar_lea.vmem %s1769_s10, 128 }
  0x62   : > { %s1099_s11 = sshll.u32 %s909_s13, 6  ;;  %p1371_p7 = scmp.ne.s32.totalorder %s1769_s10, %s1370_s14 }
  0x63   : > { %s1767_s26 = scalar_lea.hbm %s1839_s5, %s1099_s11  ;;  %p1377_p3 = scmp.lt.s32.totalorder %s1769_s10, %s1375_s1 }
  0x64   : > { %p1372_p0 = pnand %p1371_p7, %p1858_p4  ;;  %p1378_p8 = scmp.lt.s32.totalorder %s1376_s12, %s1370_s14 }
  0x65   : > { %855 = vperm.xlu1 %1329, %v847_v3   ;;  %850 = vperm.xlu0 %1328, %v846_v4  }
  0x66   : > { %p1373_p1 = pneg %p1372_p0  ;;  %p1379_p10 = por %p1378_p8, %p1377_p3 }
  0x68   : > { %p1380_p11 = pnand %p1379_p10, %p1373_p1 }
  0x69   : > { %864 = vperm.xlu1 %1329, %v860_v5   ;;  %869 = vperm.xlu0 %1328, %v861_v6  }
  0xc7   : > { %v570_v7 = vpop.permute.xlu0 %569  ;;  %v627_v9 = vpop.permute.xlu1 %626 }
  0xc8   : > { %1149 = vmatpush3.bf16.msra.mxu0 %v570_v7 }
  0xc9   : > { %1154 = vmatprep.subr.bf16.mxu0 %v1497_v0 }
  0xcb   : > { %1151 = vmatmul.mubr.msk.bf16.vlgmr.msra.gmra.mrb[0].mxu0 %vm352_vm1, %v1331_v8  ;;  %v350_v10 = vpop.permute.xlu0 %349  ;;  %v684_v13 = vpop.permute.xlu1 %683 }
  0xcc   : > { %1125 = vmatpush3.bf16.msra.mxu1 %v350_v10  ;;  %1155 = vmatpush3.bf16.msra.mxu0 %v627_v9 }
  0xcd   : > { %1156 = vmatprep.mubr.msk.bf16.mxu0 %vm1498_vm0, %v1497_v0  ;;  %1130 = vmatprep.subr.bf16.mxu1 %v1497_v0 }
  0xce   : > { %1160 = vmatprep.subr.bf16.mxu0 %v1497_v0 }
  0xcf   : > { %1127 = vmatmul.mubr.msk.bf16.vlgmr.msra.gmra.mrb[0].mxu1 %vm352_vm1, %v1332_v11  ;;  %v456_v15 = vpop.permute.xlu0 %455  ;;  %v741_v17 = vpop.permute.xlu1 %740 }
  0xd0   : > { %1131 = vmatpush3.bf16.msra.mxu1 %v1330_v1  ;;  %1132 = vmatprep.mubr.msk.bf16.mxu1 %vm1498_vm0, %v1497_v0 }
  0xd1   : > { %1136 = vmatprep.subr.bf16.mxu1 %v1497_v0 }
  0xd3   : > { %v513_v19 = vpop.permute.xlu0 %512  ;;  %v798_v21 = vpop.permute.xlu1 %797 }
  0xd7   : > { %1157 = vmatmul.mubr.msk.bf16.vlgmr.msra.gmra.mrb[0].mxu0 %vm352_vm1, %v1333_v12 }
  0xd8   : > { %1161 = vmatpush3.bf16.msra.mxu0 %v684_v13  ;;  %1162 = vmatprep.mubr.msk.bf16.mxu0 %vm1498_vm0, %v1497_v0 }
  0xd9   : > { %1166 = vmatprep.subr.bf16.mxu0 %v1497_v0 }
  0xdb   : > { %1133 = vmatmul.mubr.msk.bf16.vlgmr.msra.gmra.mrb[0].mxu1 %vm352_vm1, %v1334_v14 }
  0xdc   : > { %1137 = vmatpush3.bf16.msra.mxu1 %v456_v15  ;;  %1138 = vmatprep.mubr.msk.bf16.mxu1 %vm1498_vm0, %v1497_v0 }
  0xdd   : > { %1142 = vmatprep.subr.bf16.mxu1 %v1497_v0 }
  0xe3   : > { %1163 = vmatmul.mubr.msk.bf16.vlgmr.msra.gmra.mrb[0].mxu0 %vm352_vm1, %v1335_v16 }
  0xe4   : > { %1167 = vmatpush3.bf16.msra.mxu0 %v741_v17  ;;  %1168 = vmatprep.mubr.msk.bf16.mxu0 %vm1498_vm0, %v1497_v0  ;;  %v856_v28 = vpop.permute.xlu1 %855  ;;  %v851_v29 = vpop.permute.xlu0 %850 }
  0xe5   : > { %1172 = vmatprep.subr.bf16.mxu0 %v1497_v0 }
  0xe7   : > { %1139 = vmatmul.mubr.msk.bf16.vlgmr.msra.gmra.mrb[0].mxu1 %vm352_vm1, %v1336_v18 }
  0xe8   : > { %1143 = vmatpush3.bf16.msra.mxu1 %v513_v19  ;;  %1144 = vmatprep.mubr.msk.bf16.mxu1 %vm1498_vm0, %v1497_v0  ;;  %v865_v37 = vpop.permute.xlu1 %864  ;;  %v870_v41 = vpop.permute.xlu0 %869 }
  0xef   : > { %1169 = vmatmul.mubr.msk.bf16.vlgmr.msra.gmra.mrb[0].mxu0 %vm352_vm1, %v1337_v20 }
  0xf0   : > { %1173 = vmatpush3.bf16.msra.mxu0 %v798_v21  ;;  %1174 = vmatprep.mubr.msk.bf16.mxu0 %vm1498_vm0, %v1497_v0 }
  0xf3   : > { %1145 = vmatmul.mubr.msk.bf16.vlgmr.msra.gmra.mrb[0].mxu1 %vm352_vm1, %v1338_v22 }
  0xfb   : > { %1175 = vmatmul.mubr.msk.bf16.vlgmr.msra.gmra.mrb[0].mxu0 %vm352_vm1, %v1339_v23 }
 0x1c6   : > { %v552_v24 = vpop.f32.mrb[0].mxu1 }
 0x1c7   : > { %v1146_v25 = vpop.f32.mrb[1].mxu1 }
 0x1c8   : > { %v555_v26 = vpop.f32.mrb[2].mxu1 }
 0x1c9   : > { %v1147_v27 = vpop.f32.mrb[3].mxu1 }
 0x1ce   : > { %v837_v30 = vpop.f32.mrb[0].mxu0 }
 0x1cf   : > { %v1178_v31 = vadd.f32 %v837_v30, %v552_v24  ;;  %v1176_v32 = vpop.f32.mrb[1].mxu0 }
 0x1d0   : > { %v840_v33 = vpop.f32.mrb[2].mxu0 }
 0x1d1   : > { %v1179_v34 = vadd.f32 %v840_v33, %v555_v26  ;;  %v858_v35 = vmul.f32 %v1178_v31, %v851_v29  ;;  %v1177_v36 = vpop.f32.mrb[3].mxu0 }
 0x1d3   : > { %v872_v38 = vadd.f32 %v865_v37, %v858_v35  ;;  %v859_v39 = vmul.f32 %v1179_v34, %v856_v28 }
 0x1d5   : > { %v874_v42 = vmax.f32 %v872_v38, 0.0  ;;  %v873_v43 = vadd.f32 %v870_v41, %v859_v39 }
 0x1d7   : > { %v883_v44 = vmul.f32 %v1093_v40, %v874_v42  ;;  %v875_v45 = vmax.f32 %v873_v43, 0.0 }
 0x1d9   : > { %v1104_v46 = vpack.c.bf16 %v883_v44, %v883_v44  ;;  %v884_v47 = vmul.f32 %v1093_v40, %v875_v45 }
 0x1db   : > { %894 = vst.msk [vmem:[%s311_s9] sm:$0xf] %vm893_vm2, %v1104_v46  ;;  %v1105_v48 = vpack.c.bf16 %v884_v47, %v884_v47 }
 0x1dd   : > { %895 = vst.msk [vmem:[%s311_s9 + $0x4] sm:$0xf] %vm893_vm2, %v1105_v48 }
 0x1de   : > { %1383 = shalt.err (!%p1380_p11)
}
 0x1df   : > { %s1384_s16 = scalar_lea.hbm %s1767_s26, 128  ;;  %s1388_s29 = scalar_lea.hbm %s1839_s5, 512 }
 0x1e0   : > { %p1385_p13 = scmp.ne.s32.totalorder %s1767_s26, %s1384_s16  ;;  %p1389_p9 = scmp.lt.u32.totalorder %s1767_s26, %s1839_s5 }
 0x1e1   : > { %p1390_p12 = scmp.lt.u32.totalorder %s1388_s29, %s1384_s16  ;;  %p1392_p7 = scmp.lt.u32.totalorder %s1384_s16, %s1767_s26 }
 0x1e2   : > { %p1386_p5 = pnand %p1385_p13, %p1858_p4 }
 0x1e3   : > { %p1391_p2 = por %p1390_p12, %p1389_p9 }
 0x1e4   : > { %p1387_p6 = pneg %p1386_p5 }
 0x1e5   : > { %p1393_p0 = por %p1392_p7, %p1391_p2 }
 0x1e7   : > { %p1394_p1 = pnand %p1393_p0, %p1387_p6 }
 0x1e9   : > { %1397 = shalt.err (!%p1394_p1)
}
 0x1ea   : > { %s1509_s11 = smov 64   ;;  %s1510_s9 = smov 4  }
 0x1eb   : > { %1213 = dma.vmem_to_hbm [thread:$0]  (%p1858_p4), %s1769_s10, 128, %s1767_s26, %s1773_s27, %s1509_s11, %s1509_s11, %s1510_s9  }
 0x1ec PF: > { %p1224_p3 = scmp.ge.s32.totalorder %s1492_s28, 2  ;;  %s927_s24 = sand.u32 1, %s1452_s18  }
 0x1ed   : > { %p1859_p8 = scmp.ne.s32.totalorder %s1854_s21, 0  ;;  %s928_s25 = scalar_lea.sflag [#allocation4], %s927_s24 }
 0x1ef   : > { %p1220_p10 = pnand %p1224_p3, %p1859_p8 }
 0x1f1   : > { %1447 = dma.done.wait (!%p1220_p10), %s928_s25, 128  }
 0x1f2   : > { %1449 = vsyncadd (!%p1220_p10), %s928_s25, 4294967168  ;;  %s21_s28 = sadd.s32 1, %s1492_s28   ;;  %s1860_s15 = sld [smem:[#allocation12_spill]] }
 0x1f3   : > { %p18_p11 = scmp.ge.s32.totalorder %s21_s28, 6   ;;  %s1861_s24 = sld [smem:[#allocation8_spill]] }
 0x1f4   : > { %s1862_s25 = sld [smem:[#allocation9_spill]]  ;;  %s1863_s26 = sld [smem:[#allocation10_spill]] }
 0x1f5   : > { %s1864_s27 = sld [smem:[#allocation11_spill]]  ;;  %s1865_s18 = smov %s1456_s19 }
 0x1f6   : > { %s1866_s19 = smov %s1460_s20  ;;  %s1867_s20 = smov %s1631_s17 }
 0x1f7   : > { %s1868_s21 = smov %s1468_s22  ;;  %s1869_s22 = smov %s1472_s23 }
 0x1f8   : > { %s1870_s23 = smov %s1860_s15  ;;  %20 = sbr.rel (!%p18_p11) target bundleno = 11 (0xb), region = 102 }
 0x1ff   :  { %933 = vsyncpa [#allocation3], 1 }
 0x200   :  { %935 = vsyncpa [#allocation3 + $0x1], 1 }
 0x201   :  { %936 = vsyncpa [#allocation4], 1 }
 0x202   :  { %938 = vsyncpa [#allocation4 + $0x1], 1 }

</bundles_post_ra>
